<compile_context>
chip_gen: v7x
topology: tpu7x:2x2x1
jax: 0.10.0
libtpu: 0.0.40
codegen_flags: <defaults>
</compile_context>

<pallas_src>
import jax
import jax.numpy as jnp
from jax.experimental import pallas as pl
from jax.experimental.pallas import tpu as pltpu

HIDDEN = 128
OUT_PAD = 128      # lane-dense padded width of the policy-head output
TILE_B = 256       # batch tile (fills the 256-wide MXU on v6e/v7x; mult. of 128 on v5e)


def actor_kernel(x_ref, w1_ref, b1_ref, w2_ref, b2_ref, w3_ref, b3_ref, out_ref):
    # fc layer 1: Linear(input_dim, 128) + ReLU   (bf16 operands, f32 accumulate)
    h1 = jnp.dot(x_ref[...], w1_ref[...], preferred_element_type=jnp.float32)
    h1 = jnp.maximum(h1 + b1_ref[...], 0.0)
    # fc layer 2: Linear(128, 128) + ReLU
    h2 = jnp.dot(h1.astype(jnp.bfloat16), w2_ref[...],
                 preferred_element_type=jnp.float32)
    h2 = jnp.maximum(h2 + b2_ref[...], 0.0)
    # policy head: Linear(128, action_dim) padded to 128 lanes (no activation)
    logits = jnp.dot(h2.astype(jnp.bfloat16), w3_ref[...],
                     preferred_element_type=jnp.float32)
    out_ref[...] = (logits + b3_ref[...]).astype(out_ref.dtype)


def actor_forward(x, params, action_dim, *, tile_b=TILE_B):
    """x: [B, input_dim] float32. Returns policy logits [B, action_dim] float32."""
    w1, b1, w2, b2, w3, b3 = params
    B, input_dim = x.shape
    out_pad = w3.shape[1]                      # 128 (lane-dense)

    # Pad batch to a multiple of the tile (padded rows are discarded at the end).
    n_tiles = pl.cdiv(B, tile_b)
    b_pad = n_tiles * tile_b
    xb = x.astype(jnp.bfloat16)
    if b_pad != B:
        xb = jnp.pad(xb, ((0, b_pad - B), (0, 0)))

    const = lambda a: pl.BlockSpec(a.shape, lambda i: (0,) * a.ndim)

    out = pl.pallas_call(
        actor_kernel,
        out_shape=jax.ShapeDtypeStruct((b_pad, out_pad), jnp.float32),
        grid=(n_tiles,),
        in_specs=[
            pl.BlockSpec((tile_b, input_dim), lambda i: (i, 0)),   # x: tiled on batch
            const(w1), const(b1),                                  # weights/biases
            const(w2), const(b2),                                  # stay resident
            const(w3), const(b3),
        ],
        out_specs=pl.BlockSpec((tile_b, out_pad), lambda i: (i, 0)),
        compiler_params=pltpu.CompilerParams(
            dimension_semantics=("parallel",),
            vmem_limit_bytes=32 * 1024 * 1024,
        ),
    )(xb, w1, b1, w2, b2, w3, b3)

    return out[:B, :action_dim]


def init_params(key, input_dim, action_dim, hidden=HIDDEN, out_pad=OUT_PAD):
    """Deterministic synthetic init (PyTorch-like uniform fan-in scaling).

    Weights are stored bf16 [in, out]; biases f32 [1, out]; the policy head is
    zero-padded from action_dim to out_pad lanes.
    """
    ks = jax.random.split(key, 6)

    def linear(kw, kb, fan_in, fan_out):
        bound = 1.0 / jnp.sqrt(fan_in)
        w = jax.random.uniform(kw, (fan_in, fan_out), jnp.float32, -bound, bound)
        b = jax.random.uniform(kb, (1, fan_out), jnp.float32, -bound, bound)
        return w.astype(jnp.bfloat16), b

    w1, b1 = linear(ks[0], ks[1], input_dim, hidden)
    w2, b2 = linear(ks[2], ks[3], hidden, hidden)
    w3, b3 = linear(ks[4], ks[5], hidden, action_dim)
    # Lane-dense padding of the policy head: extra columns are zero.
    w3 = jnp.pad(w3, ((0, 0), (0, out_pad - action_dim)))
    b3 = jnp.pad(b3, ((0, 0), (0, out_pad - action_dim)))
    # TODO(synk): value head (Linear(128,1)) exists in __init__ but is unused in
    # forward(); its parameters are intentionally omitted from the kernel.
    return (w1, b1, w2, b2, w3, b3)


def reference_forward(x, params, action_dim):
    """Pure-JAX reference with the same bf16-compute / f32-accumulate dtype flow."""
    w1, b1, w2, b2, w3, b3 = params
    xb = x.astype(jnp.bfloat16)
    h = jnp.maximum(jnp.dot(xb, w1, preferred_element_type=jnp.float32) + b1, 0.0)
    h = jnp.maximum(
        jnp.dot(h.astype(jnp.bfloat16), w2, preferred_element_type=jnp.float32) + b2,
        0.0)
    logits = jnp.dot(h.astype(jnp.bfloat16), w3,
                     preferred_element_type=jnp.float32) + b3
    return logits[:, :action_dim]


if __name__ == "__main__":
    key = jax.random.PRNGKey(0)
    k_params, k_x = jax.random.split(key)

    batch, input_dim, action_dim = 256, 32, 8   # batch fills one 256-row MXU tile
    params = init_params(k_params, input_dim, action_dim)
    x = jax.random.normal(k_x, (batch, input_dim), jnp.float32)

    out = actor_forward(x, params, action_dim)
    out = jax.block_until_ready(out)

    ref = reference_forward(x, params, action_dim)
    assert out.shape == (batch, action_dim)
    assert jnp.allclose(out, ref, atol=2e-2, rtol=2e-2)

    print("KERNEL_OK")
</pallas_src>

<mosaic_0001>
module attributes {stable_mosaic.version = 11 : i64} {
  func.func @actor_kernel(%arg0: i32, %arg1: memref<256x32xbf16, #tpu.memory_space<vmem>>, %arg2: memref<32x128xbf16, #tpu.memory_space<vmem>>, %arg3: memref<1x128xf32, #tpu.memory_space<vmem>>, %arg4: memref<128x128xbf16, #tpu.memory_space<vmem>>, %arg5: memref<1x128xf32, #tpu.memory_space<vmem>>, %arg6: memref<128x128xbf16, #tpu.memory_space<vmem>>, %arg7: memref<1x128xf32, #tpu.memory_space<vmem>>, %arg8: memref<256x128xf32, #tpu.memory_space<vmem>>) attributes {dimension_semantics = [#tpu.dimension_semantics<parallel>], iteration_bounds = array<i64: 1>, scalar_prefetch = 0 : i64, scratch_operands = 0 : i64, tpu.core_type = #tpu.core_type<tc>, window_params = [{transform_indices = @transform_0, window_bounds = array<i64: 256, 32>}, {pipeline_mode = #tpu.pipeline_mode<synchronous>, transform_indices = @transform_1, window_bounds = array<i64: 32, 128>}, {pipeline_mode = #tpu.pipeline_mode<synchronous>, transform_indices = @transform_2, window_bounds = array<i64: 1, 128>}, {pipeline_mode = #tpu.pipeline_mode<synchronous>, transform_indices = @transform_3, window_bounds = array<i64: 128, 128>}, {pipeline_mode = #tpu.pipeline_mode<synchronous>, transform_indices = @transform_4, window_bounds = array<i64: 1, 128>}, {pipeline_mode = #tpu.pipeline_mode<synchronous>, transform_indices = @transform_5, window_bounds = array<i64: 128, 128>}, {pipeline_mode = #tpu.pipeline_mode<synchronous>, transform_indices = @transform_6, window_bounds = array<i64: 1, 128>}, {transform_indices = @transform_7, window_bounds = array<i64: 256, 128>}]} {
    %c0 = arith.constant 0 : index
    %c0_0 = arith.constant 0 : index
    %0 = vector.load %arg1[%c0, %c0_0] : memref<256x32xbf16, #tpu.memory_space<vmem>>, vector<256x32xbf16>
    %c0_1 = arith.constant 0 : index
    %c0_2 = arith.constant 0 : index
    %1 = vector.load %arg2[%c0_1, %c0_2] : memref<32x128xbf16, #tpu.memory_space<vmem>>, vector<32x128xbf16>
    %cst = arith.constant dense<0.000000e+00> : vector<256x128xf32>
    %2 = tpu.matmul %0, %1, %cst {dimension_numbers = #tpu.dot_dimension_numbers<[1], [0], [0], [1], [0, 0, 1, 1], [], []>} : vector<256x32xbf16>, vector<32x128xbf16>, vector<256x128xf32> -> vector<256x128xf32>
    %c0_3 = arith.constant 0 : index
    %c0_4 = arith.constant 0 : index
    %3 = vector.load %arg3[%c0_3, %c0_4] : memref<1x128xf32, #tpu.memory_space<vmem>>, vector<1x128xf32>
    %4 = vector.broadcast %3 : vector<1x128xf32> to vector<256x128xf32>
    %5 = arith.addf %2, %4 : vector<256x128xf32>
    %cst_5 = arith.constant 0.000000e+00 : f32
    %6 = vector.broadcast %cst_5 : f32 to vector<256x128xf32>
    %7 = arith.maximumf %5, %6 : vector<256x128xf32>
    %8 = arith.truncf %7 : vector<256x128xf32> to vector<256x128xbf16>
    %c0_6 = arith.constant 0 : index
    %c0_7 = arith.constant 0 : index
    %9 = vector.load %arg4[%c0_6, %c0_7] : memref<128x128xbf16, #tpu.memory_space<vmem>>, vector<128x128xbf16>
    %cst_8 = arith.constant dense<0.000000e+00> : vector<256x128xf32>
    %10 = tpu.matmul %8, %9, %cst_8 {dimension_numbers = #tpu.dot_dimension_numbers<[1], [0], [0], [1], [0, 0, 1, 1], [], []>} : vector<256x128xbf16>, vector<128x128xbf16>, vector<256x128xf32> -> vector<256x128xf32>
    %c0_9 = arith.constant 0 : index
    %c0_10 = arith.constant 0 : index
    %11 = vector.load %arg5[%c0_9, %c0_10] : memref<1x128xf32, #tpu.memory_space<vmem>>, vector<1x128xf32>
    %12 = vector.broadcast %11 : vector<1x128xf32> to vector<256x128xf32>
    %13 = arith.addf %10, %12 : vector<256x128xf32>
    %cst_11 = arith.constant 0.000000e+00 : f32
    %14 = vector.broadcast %cst_11 : f32 to vector<256x128xf32>
    %15 = arith.maximumf %13, %14 : vector<256x128xf32>
    %16 = arith.truncf %15 : vector<256x128xf32> to vector<256x128xbf16>
    %c0_12 = arith.constant 0 : index
    %c0_13 = arith.constant 0 : index
    %17 = vector.load %arg6[%c0_12, %c0_13] : memref<128x128xbf16, #tpu.memory_space<vmem>>, vector<128x128xbf16>
    %cst_14 = arith.constant dense<0.000000e+00> : vector<256x128xf32>
    %18 = tpu.matmul %16, %17, %cst_14 {dimension_numbers = #tpu.dot_dimension_numbers<[1], [0], [0], [1], [0, 0, 1, 1], [], []>} : vector<256x128xbf16>, vector<128x128xbf16>, vector<256x128xf32> -> vector<256x128xf32>
    %c0_15 = arith.constant 0 : index
    %c0_16 = arith.constant 0 : index
    %19 = vector.load %arg7[%c0_15, %c0_16] : memref<1x128xf32, #tpu.memory_space<vmem>>, vector<1x128xf32>
    %20 = vector.broadcast %19 : vector<1x128xf32> to vector<256x128xf32>
    %21 = arith.addf %18, %20 : vector<256x128xf32>
    %c0_17 = arith.constant 0 : index
    %c0_18 = arith.constant 0 : index
    %22 = vector.load %arg8[%c0_17, %c0_18] : memref<256x128xf32, #tpu.memory_space<vmem>>, vector<256x128xf32>
    tpu.vector_store %arg8[%c0_17, %c0_18], %21 {strides = array<i32>} : memref<256x128xf32, #tpu.memory_space<vmem>>, vector<256x128xf32>,
    return
  }
  func.func @transform_0(%arg0: i32) -> (i32, i32) {
    %c0_i32 = arith.constant 0 : i32
    %c0_i32_0 = arith.constant 0 : i32
    return %arg0, %c0_i32 : i32, i32
  }
  func.func @transform_1(%arg0: i32) -> (i32, i32) {
    %c0_i32 = arith.constant 0 : i32
    %c0_i32_0 = arith.constant 0 : i32
    %c0_i32_1 = arith.constant 0 : i32
    return %c0_i32, %c0_i32_0 : i32, i32
  }
  func.func @transform_2(%arg0: i32) -> (i32, i32) {
    %c0_i32 = arith.constant 0 : i32
    %c0_i32_0 = arith.constant 0 : i32
    %c0_i32_1 = arith.constant 0 : i32
    return %c0_i32, %c0_i32_0 : i32, i32
  }
  func.func @transform_3(%arg0: i32) -> (i32, i32) {
    %c0_i32 = arith.constant 0 : i32
    %c0_i32_0 = arith.constant 0 : i32
    %c0_i32_1 = arith.constant 0 : i32
    return %c0_i32, %c0_i32_0 : i32, i32
  }
  func.func @transform_4(%arg0: i32) -> (i32, i32) {
    %c0_i32 = arith.constant 0 : i32
    %c0_i32_0 = arith.constant 0 : i32
    %c0_i32_1 = arith.constant 0 : i32
    return %c0_i32, %c0_i32_0 : i32, i32
  }
  func.func @transform_5(%arg0: i32) -> (i32, i32) {
    %c0_i32 = arith.constant 0 : i32
    %c0_i32_0 = arith.constant 0 : i32
    %c0_i32_1 = arith.constant 0 : i32
    return %c0_i32, %c0_i32_0 : i32, i32
  }
  func.func @transform_6(%arg0: i32) -> (i32, i32) {
    %c0_i32 = arith.constant 0 : i32
    %c0_i32_0 = arith.constant 0 : i32
    %c0_i32_1 = arith.constant 0 : i32
    return %c0_i32, %c0_i32_0 : i32, i32
  }
  func.func @transform_7(%arg0: i32) -> (i32, i32) {
    %c0_i32 = arith.constant 0 : i32
    %c0_i32_0 = arith.constant 0 : i32
    return %arg0, %c0_i32 : i32, i32
  }
}

</mosaic_0001>

<bundles_post_ra>
// kernel: tpu_custom_call.1
= control target key start
LH: loop header
LB: loop body
LE: loop exit
PB: predicated region body
PF: predicated region fallthrough
CT: control target
= control target key end

     0   :  { %vm163_vm0 = vcmask 261120   ;;  %s1587_s0 = inlined_call_operand.vmem [shape: bf16[256,32], index: 0, kind: input, shape index: {}]   ;;  %s1588_s1 = inlined_call_operand.vmem [shape: bf16[32,128], index: 1, kind: input, shape index: {}]   ;;  %s1589_s2 = inlined_call_operand.vmem [shape: f32[1,128], index: 2, kind: input, shape index: {}]   ;;  %s1590_s3 = inlined_call_operand.vmem [shape: bf16[128,128], index: 3, kind: input, shape index: {}]   ;;  %s1591_s4 = inlined_call_operand.vmem [shape: f32[1,128], index: 4, kind: input, shape index: {}]   ;;  %s1592_s5 = inlined_call_operand.vmem [shape: bf16[128,128], index: 5, kind: input, shape index: {}]   ;;  %s1593_s6 = inlined_call_operand.vmem [shape: f32[1,128], index: 6, kind: input, shape index: {}]   ;;  %s1594_s7 = inlined_call_operand.hbm [shape: f32[256,128], index: 7, kind: output, shape index: {}]  }
   0x1   :  { %v1239_v0 = vld [vmem:[%s1588_s1] sm:$0xff]   ;;  %v1240_v1 = vld [vmem:[%s1588_s1 + $0x8] sm:$0xff]   ;;  %v1243_v4 = vld [vmem:[%s1587_s0 + $0x10] sm:$0xff]  }
   0x2   :  { %1100 = vmatprep.subr.bf16.mxu0 %v1239_v0  ;;  %v1241_v2 = vld [vmem:[%s1587_s0] sm:$0xff]   ;;  %1232 = vmatprep.subr.bf16.mxu1 %v1239_v0  ;;  %v1242_v3 = vld [vmem:[%s1587_s0 + $0x8] sm:$0xff]   ;;  %v1251_v7 = vld [vmem:[%s1587_s0 + $0x50] sm:$0xff]  }
   0x3   :  { %1101 = vmatpush3.bf16.msra.mxu0 %v1239_v0  ;;  %1234 = vmatpush3.bf16.msra.mxu1 %v1239_v0  ;;  %v1249_v5 = vld [vmem:[%s1587_s0 + $0x40] sm:$0xff]   ;;  %v1250_v6 = vld [vmem:[%s1587_s0 + $0x48] sm:$0xff]   ;;  %v1244_v8 = vld [vmem:[%s1587_s0 + $0x18] sm:$0xff]  }
   0x4   :  { %1102 = vmatprep.subr.bf16.mxu0 %v1240_v1  ;;  %1104 = vmatprep.mubr.msk.bf16.mxu0 %vm163_vm0, %v1241_v2  ;;  %v1245_v9 = vld [vmem:[%s1587_s0 + $0x20] sm:$0xff]   ;;  %v1252_v10 = vld [vmem:[%s1587_s0 + $0x58] sm:$0xff]   ;;  %v1258_v13 = vld [vmem:[%s1590_s3 + $0x8] sm:$0xff]  }
   0x5   :  { %1233 = vmatprep.subr.bf16.mxu1 %v1240_v1  ;;  %1120 = vmatprep.mubr.msk.bf16.mxu1 %vm163_vm0, %v1249_v5  ;;  %v1253_v11 = vld [vmem:[%s1587_s0 + $0x60] sm:$0xff]   ;;  %v1246_v14 = vld [vmem:[%s1587_s0 + $0x28] sm:$0xff]   ;;  %v1247_v15 = vld [vmem:[%s1587_s0 + $0x30] sm:$0xff]  }
   0x6   :  { %v1257_v12 = vld [vmem:[%s1590_s3] sm:$0xff]   ;;  %v1254_v16 = vld [vmem:[%s1587_s0 + $0x68] sm:$0xff]   ;;  %v1259_v17 = vld [vmem:[%s1590_s3 + $0x10] sm:$0xff]  }
   0x7   :  { %1103 = vmatpush3.bf16.msra.mxu0 %v1240_v1  ;;  %1235 = vmatpush3.bf16.msra.mxu1 %v1240_v1  ;;  %v1255_v18 = vld [vmem:[%s1587_s0 + $0x70] sm:$0xff]   ;;  %v1260_v19 = vld [vmem:[%s1590_s3 + $0x18] sm:$0xff]  }
   0x8   :  { %1136 = vmatprep.subr.bf16.mxu1 %v1257_v12  ;;  %v1248_v20 = vld [vmem:[%s1587_s0 + $0x38] sm:$0xff]  }
   0xa   :  { %1105 = vmatmul.mubr.msk.bf16.vlgmr.msra.gmra.mrb[0].mxu0 %vm163_vm0, %v1242_v3  ;;  %1121 = vmatmul.mubr.msk.bf16.vlgmr.msra.gmra.mrb[0].mxu1 %vm163_vm0, %v1250_v6 }
   0xb   :  { %1108 = vmatprep.mubr.msk.bf16.mxu0 %vm163_vm0, %v1243_v4  ;;  %1124 = vmatprep.mubr.msk.bf16.mxu1 %vm163_vm0, %v1251_v7 }
   0xc   :  { %1137 = vmatpush3.bf16.msra.mxu1 %v1257_v12 }
   0xd   :  { %1138 = vmatprep.subr.bf16.mxu1 %v1258_v13 }
  0x10   :  { %1139 = vmatpush3.bf16.msra.mxu1 %v1258_v13 }
  0x11   :  { %1140 = vmatprep.subr.bf16.mxu1 %v1259_v17 }
  0x12   :  { %1109 = vmatmul.mubr.msk.bf16.gmra.mrb[4].mxu0 %vm163_vm0, %v1244_v8  ;;  %1125 = vmatmul.mubr.msk.bf16.gmra.mrb[4].mxu1 %vm163_vm0, %v1252_v10 }
  0x13   :  { %1112 = vmatprep.mubr.msk.bf16.mxu0 %vm163_vm0, %v1245_v9  ;;  %1128 = vmatprep.mubr.msk.bf16.mxu1 %vm163_vm0, %v1253_v11 }
  0x14   :  { %1141 = vmatpush3.bf16.msra.mxu1 %v1259_v17 }
  0x1a   :  { %1113 = vmatmul.mubr.msk.bf16.gmra.mrb[8].mxu0 %vm163_vm0, %v1246_v14  ;;  %1129 = vmatmul.mubr.msk.bf16.gmra.mrb[8].mxu1 %vm163_vm0, %v1254_v16 }
  0x1b   :  { %1116 = vmatprep.mubr.msk.bf16.mxu0 %vm163_vm0, %v1247_v15  ;;  %1132 = vmatprep.mubr.msk.bf16.mxu1 %vm163_vm0, %v1255_v18 }
  0x1c   :  { %12 = vsyncpa [#allocation3], 0  ;;  %1142 = vmatprep.subr.bf16.mxu1 %v1260_v19  ;;  %v1261_v21 = vld [vmem:[%s1590_s3 + $0x20] sm:$0xff]   ;;  %v1256_v22 = vld [vmem:[%s1587_s0 + $0x78] sm:$0xff]  }
  0x1d   :  { %1143 = vmatpush3.bf16.msra.mxu1 %v1260_v19  ;;  %v1262_v23 = vld [vmem:[%s1590_s3 + $0x28] sm:$0xff]   ;;  %v1263_v24 = vld [vmem:[%s1590_s3 + $0x30] sm:$0xff]   ;;  %v1264_v25 = vld [vmem:[%s1590_s3 + $0x38] sm:$0xff]  }
  0x1e   :  { %1144 = vmatprep.subr.bf16.mxu1 %v1261_v21  ;;  %v1265_v26 = vld [vmem:[%s1592_s5] sm:$0xff]   ;;  %v1266_v27 = vld [vmem:[%s1592_s5 + $0x8] sm:$0xff]   ;;  %v1267_v28 = vld [vmem:[%s1592_s5 + $0x10] sm:$0xff]  }
  0x1f   :  { %1184 = vmatprep.subr.bf16.mxu0 %v1265_v26  ;;  %v1268_v29 = vld [vmem:[%s1592_s5 + $0x18] sm:$0xff]   ;;  %v1269_v30 = vld [vmem:[%s1592_s5 + $0x20] sm:$0xff]   ;;  %v1270_v31 = vld [vmem:[%s1592_s5 + $0x28] sm:$0xff]  }
  0x20   :  { %1185 = vmatpush3.bf16.msra.mxu0 %v1265_v26  ;;  %v1455_v32 = vld [vmem:[%s1589_s2] ss:$0 sm:$0xff] }
  0x21   :  { %1145 = vmatpush3.bf16.msra.mxu1 %v1261_v21  ;;  %1186 = vmatprep.subr.bf16.mxu0 %v1266_v27 }
  0x22   :  { %1117 = vmatmul.mubr.msk.bf16.gmra.mrb[12].mxu0 %vm163_vm0, %v1248_v20  ;;  %1133 = vmatmul.mubr.msk.bf16.gmra.mrb[12].mxu1 %vm163_vm0, %v1256_v22 }
  0x23   :  { %1146 = vmatprep.subr.bf16.mxu1 %v1262_v23 }
  0x24   :  { %1187 = vmatpush3.bf16.msra.mxu0 %v1266_v27 }
  0x25   :  { %1147 = vmatpush3.bf16.msra.mxu1 %v1262_v23  ;;  %1188 = vmatprep.subr.bf16.mxu0 %v1267_v28 }
  0x26   :  { %1148 = vmatprep.subr.bf16.mxu1 %v1263_v24 }
  0x28   :  { %1189 = vmatpush3.bf16.msra.mxu0 %v1267_v28 }
  0x29   :  { %1149 = vmatpush3.bf16.msra.mxu1 %v1263_v24  ;;  %1190 = vmatprep.subr.bf16.mxu0 %v1268_v29 }
  0x2a   :  { %1150 = vmatprep.subr.bf16.mxu1 %v1264_v25 }
  0x2c   :  { %1191 = vmatpush3.bf16.msra.mxu0 %v1268_v29 }
  0x2d   :  { %1151 = vmatpush3.bf16.msra.mxu1 %v1264_v25  ;;  %1192 = vmatprep.subr.bf16.mxu0 %v1269_v30 }
  0x30   :  { %1193 = vmatpush3.bf16.msra.mxu0 %v1269_v30 }
  0x31   :  { %1194 = vmatprep.subr.bf16.mxu0 %v1270_v31 }
  0x34   :  { %1195 = vmatpush3.bf16.msra.mxu0 %v1270_v31 }
  0xdd   :  { %v1106_v33 = vpop.f32.mrb[0].mxu0  ;;  %v1122_v40 = vpop.f32.mrb[0].mxu1 }
  0xde   :  { %v255_v34 = vadd.f32 %v1106_v33, %v1455_v32  ;;  %v246_v35 = vpop.f32.mrb[1].mxu0  ;;  %v319_v42 = vadd.f32 %v1122_v40, %v1455_v32  ;;  %v310_v43 = vpop.f32.mrb[1].mxu1 }
  0xdf   :  { %v247_v36 = vadd.f32 %v1455_v32, %v246_v35  ;;  %v1107_v37 = vpop.f32.mrb[2].mxu0  ;;  %v311_v46 = vadd.f32 %v1455_v32, %v310_v43  ;;  %v1123_v47 = vpop.f32.mrb[2].mxu1 }
  0xe0   :  { %v258_v38 = vadd.f32 %v1107_v37, %v1455_v32  ;;  %v249_v39 = vpop.f32.mrb[3].mxu0  ;;  %v375_v44 = vmax.f32 %v255_v34, 0.0  ;;  %v391_v50 = vmax.f32 %v319_v42, 0.0  ;;  %v322_v51 = vadd.f32 %v1123_v47, %v1455_v32  ;;  %v313_v52 = vpop.f32.mrb[3].mxu1 }
  0xe1   :  { %v250_v41 = vadd.f32 %v1455_v32, %v249_v39  ;;  %v373_v48 = vmax.f32 %v247_v36, 0.0  ;;  %v389_v54 = vmax.f32 %v311_v46, 0.0  ;;  %v314_v55 = vadd.f32 %v1455_v32, %v313_v52 }
  0xe2   :  { %v376_v45 = vmax.f32 %v258_v38, 0.0  ;;  %v392_v58 = vmax.f32 %v322_v51, 0.0 }
  0xe3   :  { %v374_v49 = vmax.f32 %v250_v41, 0.0  ;;  %v390_v61 = vmax.f32 %v314_v55, 0.0 }
  0xe4   :  { %v406_v53 = vpack.c.bf16 %v376_v45, %v375_v44  ;;  %v1467_v0 = vpack.c.bf16 %v392_v58, %v391_v50 }
  0xe5   :  { %v405_v56 = vpack.c.bf16 %v374_v49, %v373_v48  ;;  %v1110_v57 = vpop.f32.mrb[4].mxu0  ;;  %v1470_v3 = vpack.c.bf16 %v390_v61, %v389_v54  ;;  %v1126_v4 = vpop.f32.mrb[4].mxu1 }
  0xe6   :  { %v271_v59 = vadd.f32 %v1110_v57, %v1455_v32  ;;  %v262_v60 = vpop.f32.mrb[5].mxu0  ;;  %v335_v6 = vadd.f32 %v1126_v4, %v1455_v32  ;;  %v326_v7 = vpop.f32.mrb[5].mxu1 }
  0xe7   :  { %v263_v62 = vadd.f32 %v1455_v32, %v262_v60  ;;  %v1111_v63 = vpop.f32.mrb[6].mxu0  ;;  %1152 = vmatprep.mubr.bf16.mxu1 %v405_v56  ;;  %v327_v10 = vadd.f32 %v1455_v32, %v326_v7  ;;  %v1127_v11 = vpop.f32.mrb[6].mxu1 }
  0xe8   :  { %v274_v1 = vadd.f32 %v1111_v63, %v1455_v32  ;;  %v265_v2 = vpop.f32.mrb[7].mxu0  ;;  %1153 = vmatmul.mubr.bf16.vlgmr.msra.gmra.mrb[16].mxu1 %v406_v53  ;;  %v379_v8 = vmax.f32 %v271_v59, 0.0  ;;  %v395_v14 = vmax.f32 %v335_v6, 0.0  ;;  %v338_v15 = vadd.f32 %v1127_v11, %v1455_v32  ;;  %v329_v16 = vpop.f32.mrb[7].mxu1 }
  0xe9   :  { %v266_v5 = vadd.f32 %v1455_v32, %v265_v2  ;;  %v377_v12 = vmax.f32 %v263_v62, 0.0  ;;  %v393_v18 = vmax.f32 %v327_v10, 0.0  ;;  %v330_v19 = vadd.f32 %v1455_v32, %v329_v16 }
  0xea   :  { %v380_v9 = vmax.f32 %v274_v1, 0.0  ;;  %v396_v22 = vmax.f32 %v338_v15, 0.0 }
  0xeb   :  { %v378_v13 = vmax.f32 %v266_v5, 0.0  ;;  %v394_v25 = vmax.f32 %v330_v19, 0.0 }
  0xec   :  { %v408_v17 = vpack.c.bf16 %v380_v9, %v379_v8  ;;  %v416_v28 = vpack.c.bf16 %v396_v22, %v395_v14 }
  0xed   :  { %v407_v20 = vpack.c.bf16 %v378_v13, %v377_v12  ;;  %v1114_v21 = vpop.f32.mrb[8].mxu0  ;;  %v415_v31 = vpack.c.bf16 %v394_v25, %v393_v18  ;;  %v1130_v33 = vpop.f32.mrb[8].mxu1 }
  0xee   :  { %v287_v23 = vadd.f32 %v1114_v21, %v1455_v32  ;;  %v278_v24 = vpop.f32.mrb[9].mxu0  ;;  %v351_v35 = vadd.f32 %v1130_v33, %v1455_v32  ;;  %v342_v36 = vpop.f32.mrb[9].mxu1 }
  0xef   :  { %v279_v26 = vadd.f32 %v1455_v32, %v278_v24  ;;  %v1115_v27 = vpop.f32.mrb[10].mxu0  ;;  %1156 = vmatprep.mubr.bf16.mxu1 %v407_v20  ;;  %v343_v39 = vadd.f32 %v1455_v32, %v342_v36  ;;  %v1131_v40 = vpop.f32.mrb[10].mxu1  ;;  %v1272_v20 = vld [vmem:[%s1592_s5 + $0x38] sm:$0xff]  }
  0xf0   :  { %v290_v29 = vadd.f32 %v1115_v27, %v1455_v32  ;;  %v281_v30 = vpop.f32.mrb[11].mxu0  ;;  %1157 = vmatmul.mubr.bf16.gmra.mrb[20].mxu1 %v408_v17  ;;  %v383_v37 = vmax.f32 %v287_v23, 0.0  ;;  %v399_v43 = vmax.f32 %v351_v35, 0.0  ;;  %v354_v44 = vadd.f32 %v1131_v40, %v1455_v32  ;;  %v345_v45 = vpop.f32.mrb[11].mxu1 }
  0xf1   :  { %v282_v34 = vadd.f32 %v1455_v32, %v281_v30  ;;  %v381_v41 = vmax.f32 %v279_v26, 0.0  ;;  %v397_v47 = vmax.f32 %v343_v39, 0.0  ;;  %v346_v48 = vadd.f32 %v1455_v32, %v345_v45 }
  0xf2   :  { %v384_v38 = vmax.f32 %v290_v29, 0.0  ;;  %v400_v51 = vmax.f32 %v354_v44, 0.0 }
  0xf3   :  { %v382_v42 = vmax.f32 %v282_v34, 0.0  ;;  %v398_v54 = vmax.f32 %v346_v48, 0.0 }
  0xf4   :  { %v410_v46 = vpack.c.bf16 %v384_v38, %v383_v37  ;;  %v418_v57 = vpack.c.bf16 %v400_v51, %v399_v43 }
  0xf5   :  { %v409_v49 = vpack.c.bf16 %v382_v42, %v381_v41  ;;  %v1118_v50 = vpop.f32.mrb[12].mxu0  ;;  %v417_v60 = vpack.c.bf16 %v398_v54, %v397_v47  ;;  %v1134_v61 = vpop.f32.mrb[12].mxu1 }
  0xf6   :  { %v303_v52 = vadd.f32 %v1118_v50, %v1455_v32  ;;  %v294_v53 = vpop.f32.mrb[13].mxu0  ;;  %v367_v63 = vadd.f32 %v1134_v61, %v1455_v32  ;;  %v358_v1 = vpop.f32.mrb[13].mxu1 }
  0xf7   :  { %v295_v55 = vadd.f32 %v1455_v32, %v294_v53  ;;  %v1119_v56 = vpop.f32.mrb[14].mxu0  ;;  %1160 = vmatprep.mubr.bf16.mxu1 %v409_v49  ;;  %v359_v5 = vadd.f32 %v1455_v32, %v358_v1  ;;  %v1135_v6 = vpop.f32.mrb[14].mxu1 }
  0xf8   :  { %v306_v58 = vadd.f32 %v1119_v56, %v1455_v32  ;;  %v297_v59 = vpop.f32.mrb[15].mxu0  ;;  %1161 = vmatmul.mubr.bf16.gmra.mrb[24].mxu1 %v410_v46  ;;  %v387_v2 = vmax.f32 %v303_v52, 0.0  ;;  %v403_v9 = vmax.f32 %v367_v63, 0.0  ;;  %v370_v10 = vadd.f32 %v1135_v6, %v1455_v32  ;;  %v361_v11 = vpop.f32.mrb[15].mxu1 }
  0xf9   :  { %v298_v62 = vadd.f32 %v1455_v32, %v297_v59  ;;  %v385_v7 = vmax.f32 %v295_v55, 0.0  ;;  %v401_v13 = vmax.f32 %v359_v5, 0.0  ;;  %v362_v14 = vadd.f32 %v1455_v32, %v361_v11  ;;  %v1271_v32 = vld [vmem:[%s1592_s5 + $0x30] sm:$0xff]  }
  0xfa   :  { %v388_v4 = vmax.f32 %v306_v58, 0.0  ;;  %v404_v16 = vmax.f32 %v370_v10, 0.0  ;;  %1196 = vmatprep.subr.bf16.mxu0 %v1271_v32 }
  0xfb   :  { %v386_v8 = vmax.f32 %v298_v62, 0.0  ;;  %v402_v17 = vmax.f32 %v362_v14, 0.0  ;;  %1197 = vmatpush3.bf16.msra.mxu0 %v1271_v32 }
  0xfc   :  { %v412_v12 = vpack.c.bf16 %v388_v4, %v387_v2  ;;  %v420_v18 = vpack.c.bf16 %v404_v16, %v403_v9  ;;  %1198 = vmatprep.subr.bf16.mxu0 %v1272_v20 }
  0xfd   :  { %v411_v15 = vpack.c.bf16 %v386_v8, %v385_v7  ;;  %v419_v19 = vpack.c.bf16 %v402_v17, %v401_v13 }
  0xff   :  { %1164 = vmatprep.mubr.bf16.mxu1 %v411_v15  ;;  %1199 = vmatpush3.bf16.msra.mxu0 %v1272_v20 }
 0x100   :  { %1165 = vmatmul.mubr.bf16.gmra.mrb[28].mxu1 %v412_v12 }
 0x101   :  { %1168 = vmatprep.mubr.bf16.mxu1 %v1470_v3 }
 0x108   :  { %1169 = vmatmul.mubr.bf16.gmra.mrb[32].mxu1 %v1467_v0  ;;  %v1504_v0 = vld [vmem:[%s1591_s4] ss:$0 sm:$0xff] }
 0x109   :  { %1172 = vmatprep.mubr.bf16.mxu1 %v415_v31 }
 0x110   :  { %1173 = vmatmul.mubr.bf16.gmra.mrb[36].mxu1 %v416_v28 }
 0x111   :  { %1176 = vmatprep.mubr.bf16.mxu1 %v417_v60 }
 0x118   :  { %1177 = vmatmul.mubr.bf16.gmra.mrb[40].mxu1 %v418_v57 }
 0x119   :  { %1180 = vmatprep.mubr.bf16.mxu1 %v419_v19 }
 0x120   :  { %1181 = vmatmul.mubr.bf16.gmra.mrb[44].mxu1 %v420_v18 }
 0x1bb   :  { %v1154_v3 = vpop.f32.mrb[16].mxu1 }
 0x1bc   :  { %v535_v21 = vadd.f32 %v1154_v3, %v1504_v0  ;;  %v526_v22 = vpop.f32.mrb[17].mxu1 }
 0x1bd   :  { %v527_v23 = vadd.f32 %v1504_v0, %v526_v22  ;;  %v1155_v24 = vpop.f32.mrb[18].mxu1 }
 0x1be   :  { %v538_v25 = vadd.f32 %v1155_v24, %v1504_v0  ;;  %v529_v26 = vpop.f32.mrb[19].mxu1  ;;  %v655_v28 = vmax.f32 %v535_v21, 0.0 }
 0x1bf   :  { %v530_v27 = vadd.f32 %v1504_v0, %v529_v26  ;;  %v653_v30 = vmax.f32 %v527_v23, 0.0 }
 0x1c0   :  { %v656_v29 = vmax.f32 %v538_v25, 0.0 }
 0x1c1   :  { %v654_v31 = vmax.f32 %v530_v27, 0.0 }
 0x1c2   :  { %v686_v33 = vpack.c.bf16 %v656_v29, %v655_v28 }
 0x1c3   :  { %v685_v34 = vpack.c.bf16 %v654_v31, %v653_v30  ;;  %v1158_v35 = vpop.f32.mrb[20].mxu1 }
 0x1c4   :  { %v551_v36 = vadd.f32 %v1158_v35, %v1504_v0  ;;  %v542_v37 = vpop.f32.mrb[21].mxu1 }
 0x1c5   :  { %v543_v38 = vadd.f32 %v1504_v0, %v542_v37  ;;  %v1159_v39 = vpop.f32.mrb[22].mxu1  ;;  %1200 = vmatprep.mubr.bf16.mxu0 %v685_v34 }
 0x1c6   :  { %v554_v40 = vadd.f32 %v1159_v39, %v1504_v0  ;;  %v545_v41 = vpop.f32.mrb[23].mxu1  ;;  %1201 = vmatmul.mubr.bf16.vlgmr.msra.gmra.mrb[16].mxu0 %v686_v33  ;;  %v659_v43 = vmax.f32 %v551_v36, 0.0 }
 0x1c7   :  { %v546_v42 = vadd.f32 %v1504_v0, %v545_v41  ;;  %v657_v45 = vmax.f32 %v543_v38, 0.0 }
 0x1c8   :  { %v660_v44 = vmax.f32 %v554_v40, 0.0 }
 0x1c9   :  { %v658_v46 = vmax.f32 %v546_v42, 0.0 }
 0x1ca   :  { %v688_v47 = vpack.c.bf16 %v660_v44, %v659_v43 }
 0x1cb   :  { %v687_v48 = vpack.c.bf16 %v658_v46, %v657_v45  ;;  %v1162_v49 = vpop.f32.mrb[24].mxu1 }
 0x1cc   :  { %v567_v50 = vadd.f32 %v1162_v49, %v1504_v0  ;;  %v558_v51 = vpop.f32.mrb[25].mxu1 }
 0x1cd   :  { %v559_v52 = vadd.f32 %v1504_v0, %v558_v51  ;;  %v1163_v53 = vpop.f32.mrb[26].mxu1  ;;  %1204 = vmatprep.mubr.bf16.mxu0 %v687_v48 }
 0x1ce   :  { %v570_v54 = vadd.f32 %v1163_v53, %v1504_v0  ;;  %v561_v55 = vpop.f32.mrb[27].mxu1  ;;  %1205 = vmatmul.mubr.bf16.gmra.mrb[20].mxu0 %v688_v47  ;;  %v663_v57 = vmax.f32 %v567_v50, 0.0 }
 0x1cf   :  { %v562_v56 = vadd.f32 %v1504_v0, %v561_v55  ;;  %v661_v59 = vmax.f32 %v559_v52, 0.0 }
 0x1d0   :  { %v664_v58 = vmax.f32 %v570_v54, 0.0 }
 0x1d1   :  { %v662_v60 = vmax.f32 %v562_v56, 0.0 }
 0x1d2   :  { %v690_v61 = vpack.c.bf16 %v664_v58, %v663_v57 }
 0x1d3   :  { %v689_v62 = vpack.c.bf16 %v662_v60, %v661_v59  ;;  %v1166_v63 = vpop.f32.mrb[28].mxu1 }
 0x1d4   :  { %v583_v1 = vadd.f32 %v1166_v63, %v1504_v0  ;;  %v574_v2 = vpop.f32.mrb[29].mxu1 }
 0x1d5   :  { %v575_v4 = vadd.f32 %v1504_v0, %v574_v2  ;;  %v1167_v5 = vpop.f32.mrb[30].mxu1  ;;  %1208 = vmatprep.mubr.bf16.mxu0 %v689_v62 }
 0x1d6   :  { %v586_v6 = vadd.f32 %v1167_v5, %v1504_v0  ;;  %v577_v7 = vpop.f32.mrb[31].mxu1  ;;  %1209 = vmatmul.mubr.bf16.gmra.mrb[24].mxu0 %v690_v61  ;;  %v667_v9 = vmax.f32 %v583_v1, 0.0 }
 0x1d7   :  { %v578_v8 = vadd.f32 %v1504_v0, %v577_v7  ;;  %v665_v11 = vmax.f32 %v575_v4, 0.0 }
 0x1d8   :  { %v668_v10 = vmax.f32 %v586_v6, 0.0 }
 0x1d9   :  { %v666_v12 = vmax.f32 %v578_v8, 0.0  ;;  %v1541_v8 = vld [vmem:[%s1593_s6] ss:$0 sm:$0xff]  ;;  %s1297_s6 = smov [#allocation2]  }
 0x1da   :  { %v692_v13 = vpack.c.bf16 %v668_v10, %v667_v9  ;;  %s970_s21 = sshll.u32 %s1297_s6, 4  ;;  %s971_s21 = int_to_ptr.vmem [resolvable:$true] %s970_s21 }
 0x1db   :  { %v691_v14 = vpack.c.bf16 %v666_v12, %v665_v11  ;;  %v1170_v15 = vpop.f32.mrb[32].mxu1  ;;  %s1273_s22 = scalar_lea.vmem %s971_s21, 4096  ;;  %p1278_p1 = scmp.lt.s32.totalorder %s971_s21, %s971_s21 }
 0x1dc   :  { %v599_v16 = vadd.f32 %v1170_v15, %v1504_v0  ;;  %v590_v17 = vpop.f32.mrb[33].mxu1  ;;  %p1274_p0 = scmp.ne.s32.totalorder %s971_s21, %s1273_s22  ;;  %p1279_p2 = scmp.lt.s32.totalorder %s1273_s22, %s1273_s22 }
 0x1dd   :  { %v591_v18 = vadd.f32 %v1504_v0, %v590_v17  ;;  %v1171_v19 = vpop.f32.mrb[34].mxu1  ;;  %1212 = vmatprep.mubr.bf16.mxu0 %v691_v14 }
 0x1de   :  { %v602_v32 = vadd.f32 %v1171_v19, %v1504_v0  ;;  %v593_v20 = vpop.f32.mrb[35].mxu1  ;;  %1213 = vmatmul.mubr.bf16.gmra.mrb[28].mxu0 %v692_v13  ;;  %v671_v21 = vmax.f32 %v599_v16, 0.0  ;;  %p1280_p3 = por %p1279_p2, %p1278_p1 }
 0x1df   :  { %v594_v3 = vadd.f32 %v1504_v0, %v593_v20  ;;  %v669_v23 = vmax.f32 %v591_v18, 0.0 }
 0x1e0   :  { %v672_v22 = vmax.f32 %v602_v32, 0.0  ;;  %p1281_p4 = pnand %p1280_p3, %p1274_p0 }
 0x1e1   :  { %v670_v24 = vmax.f32 %v594_v3, 0.0 }
 0x1e2   :  { %v694_v25 = vpack.c.bf16 %v672_v22, %v671_v21 }
 0x1e3   :  { %v693_v26 = vpack.c.bf16 %v670_v24, %v669_v23  ;;  %v1174_v27 = vpop.f32.mrb[36].mxu1 }
 0x1e4   :  { %v615_v28 = vadd.f32 %v1174_v27, %v1504_v0  ;;  %v606_v29 = vpop.f32.mrb[37].mxu1 }
 0x1e5   :  { %v607_v30 = vadd.f32 %v1504_v0, %v606_v29  ;;  %v1175_v31 = vpop.f32.mrb[38].mxu1  ;;  %1216 = vmatprep.mubr.bf16.mxu0 %v693_v26 }
 0x1e6   :  { %v618_v33 = vadd.f32 %v1175_v31, %v1504_v0  ;;  %v609_v34 = vpop.f32.mrb[39].mxu1  ;;  %1217 = vmatmul.mubr.bf16.gmra.mrb[32].mxu0 %v694_v25  ;;  %v675_v36 = vmax.f32 %v615_v28, 0.0 }
 0x1e7   :  { %v610_v35 = vadd.f32 %v1504_v0, %v609_v34  ;;  %v673_v38 = vmax.f32 %v607_v30, 0.0 }
 0x1e8   :  { %v676_v37 = vmax.f32 %v618_v33, 0.0 }
 0x1e9   :  { %v674_v39 = vmax.f32 %v610_v35, 0.0 }
 0x1ea   :  { %v696_v40 = vpack.c.bf16 %v676_v37, %v675_v36 }
 0x1eb   :  { %v695_v41 = vpack.c.bf16 %v674_v39, %v673_v38  ;;  %v1178_v42 = vpop.f32.mrb[40].mxu1 }
 0x1ec   :  { %v631_v43 = vadd.f32 %v1178_v42, %v1504_v0  ;;  %v622_v44 = vpop.f32.mrb[41].mxu1 }
 0x1ed   :  { %v623_v45 = vadd.f32 %v1504_v0, %v622_v44  ;;  %v1179_v46 = vpop.f32.mrb[42].mxu1  ;;  %1220 = vmatprep.mubr.bf16.mxu0 %v695_v41 }
 0x1ee   :  { %v634_v47 = vadd.f32 %v1179_v46, %v1504_v0  ;;  %v625_v48 = vpop.f32.mrb[43].mxu1  ;;  %1221 = vmatmul.mubr.bf16.gmra.mrb[36].mxu0 %v696_v40  ;;  %v679_v50 = vmax.f32 %v631_v43, 0.0 }
 0x1ef   :  { %v626_v49 = vadd.f32 %v1504_v0, %v625_v48  ;;  %v677_v52 = vmax.f32 %v623_v45, 0.0 }
 0x1f0   :  { %v680_v51 = vmax.f32 %v634_v47, 0.0 }
 0x1f1   :  { %v678_v53 = vmax.f32 %v626_v49, 0.0 }
 0x1f2   :  { %v698_v54 = vpack.c.bf16 %v680_v51, %v679_v50 }
 0x1f3   :  { %v697_v55 = vpack.c.bf16 %v678_v53, %v677_v52  ;;  %v1182_v56 = vpop.f32.mrb[44].mxu1 }
 0x1f4   :  { %v647_v57 = vadd.f32 %v1182_v56, %v1504_v0  ;;  %v638_v58 = vpop.f32.mrb[45].mxu1 }
 0x1f5   :  { %v639_v59 = vadd.f32 %v1504_v0, %v638_v58  ;;  %v1183_v60 = vpop.f32.mrb[46].mxu1  ;;  %1224 = vmatprep.mubr.bf16.mxu0 %v697_v55 }
 0x1f6   :  { %v650_v61 = vadd.f32 %v1183_v60, %v1504_v0  ;;  %v641_v62 = vpop.f32.mrb[47].mxu1  ;;  %1225 = vmatmul.mubr.bf16.gmra.mrb[40].mxu0 %v698_v54  ;;  %v683_v1 = vmax.f32 %v647_v57, 0.0 }
 0x1f7   :  { %v642_v63 = vadd.f32 %v1504_v0, %v641_v62  ;;  %v681_v4 = vmax.f32 %v639_v59, 0.0 }
 0x1f8   :  { %v684_v2 = vmax.f32 %v650_v61, 0.0 }
 0x1f9   :  { %v682_v5 = vmax.f32 %v642_v63, 0.0 }
 0x1fa   :  { %v700_v6 = vpack.c.bf16 %v684_v2, %v683_v1 }
 0x1fb   :  { %v699_v7 = vpack.c.bf16 %v682_v5, %v681_v4 }
 0x1fd   :  { %1228 = vmatprep.mubr.bf16.mxu0 %v699_v7 }
 0x1fe   :  { %1229 = vmatmul.mubr.bf16.gmra.mrb[44].mxu0 %v700_v6 }
 0x299   :  { %v1202_v9 = vpop.f32.mrb[16].mxu0 }
 0x29a   :  { %v815_v10 = vadd.f32 %v1202_v9, %v1541_v8  ;;  %v806_v11 = vpop.f32.mrb[17].mxu0 }
 0x29b   :  { %v807_v12 = vadd.f32 %v1541_v8, %v806_v11  ;;  %v1203_v0 = vpop.f32.mrb[18].mxu0 }
 0x29c   :  { %935 = vst [vmem:[#allocation2 + $0x10] sm:$0xff] %v815_v10  ;;  %v818_v13 = vadd.f32 %v1203_v0, %v1541_v8  ;;  %v809_v14 = vpop.f32.mrb[19].mxu0 }
 0x29d   :  { %933 = vst [vmem:[#allocation2] sm:$0xff] %v807_v12  ;;  %v810_v15 = vadd.f32 %v1541_v8, %v809_v14 }
 0x29e   :  { %936 = vst [vmem:[#allocation2 + $0x18] sm:$0xff] %v818_v13 }
 0x29f   :  { %934 = vst [vmem:[#allocation2 + $0x8] sm:$0xff] %v810_v15 }
 0x2a1   :  { %v1206_v16 = vpop.f32.mrb[20].mxu0 }
 0x2a2   :  { %v831_v17 = vadd.f32 %v1206_v16, %v1541_v8  ;;  %v822_v18 = vpop.f32.mrb[21].mxu0 }
 0x2a3   :  { %v823_v19 = vadd.f32 %v1541_v8, %v822_v18  ;;  %v1207_v32 = vpop.f32.mrb[22].mxu0 }
 0x2a4   :  { %939 = vst [vmem:[#allocation2 + $0x30] sm:$0xff] %v831_v17  ;;  %v834_v20 = vadd.f32 %v1207_v32, %v1541_v8  ;;  %v825_v3 = vpop.f32.mrb[23].mxu0 }
 0x2a5   :  { %937 = vst [vmem:[#allocation2 + $0x20] sm:$0xff] %v823_v19  ;;  %v826_v21 = vadd.f32 %v1541_v8, %v825_v3 }
 0x2a6   :  { %940 = vst [vmem:[#allocation2 + $0x38] sm:$0xff] %v834_v20 }
 0x2a7   :  { %938 = vst [vmem:[#allocation2 + $0x28] sm:$0xff] %v826_v21 }
 0x2a9   :  { %v1210_v22 = vpop.f32.mrb[24].mxu0 }
 0x2aa   :  { %v847_v23 = vadd.f32 %v1210_v22, %v1541_v8  ;;  %v838_v24 = vpop.f32.mrb[25].mxu0 }
 0x2ab   :  { %v839_v25 = vadd.f32 %v1541_v8, %v838_v24  ;;  %v1211_v26 = vpop.f32.mrb[26].mxu0 }
 0x2ac   :  { %943 = vst [vmem:[#allocation2 + $0x50] sm:$0xff] %v847_v23  ;;  %v850_v27 = vadd.f32 %v1211_v26, %v1541_v8  ;;  %v841_v28 = vpop.f32.mrb[27].mxu0 }
 0x2ad   :  { %941 = vst [vmem:[#allocation2 + $0x40] sm:$0xff] %v839_v25  ;;  %v842_v29 = vadd.f32 %v1541_v8, %v841_v28 }
 0x2ae   :  { %944 = vst [vmem:[#allocation2 + $0x58] sm:$0xff] %v850_v27 }
 0x2af   :  { %942 = vst [vmem:[#allocation2 + $0x48] sm:$0xff] %v842_v29 }
 0x2b1   :  { %v1214_v30 = vpop.f32.mrb[28].mxu0 }
 0x2b2   :  { %v863_v31 = vadd.f32 %v1214_v30, %v1541_v8  ;;  %v854_v33 = vpop.f32.mrb[29].mxu0 }
 0x2b3   :  { %v855_v34 = vadd.f32 %v1541_v8, %v854_v33  ;;  %v1215_v35 = vpop.f32.mrb[30].mxu0 }
 0x2b4   :  { %947 = vst [vmem:[#allocation2 + $0x70] sm:$0xff] %v863_v31  ;;  %v866_v36 = vadd.f32 %v1215_v35, %v1541_v8  ;;  %v857_v37 = vpop.f32.mrb[31].mxu0 }
 0x2b5   :  { %945 = vst [vmem:[#allocation2 + $0x60] sm:$0xff] %v855_v34  ;;  %v858_v38 = vadd.f32 %v1541_v8, %v857_v37 }
 0x2b6   :  { %948 = vst [vmem:[#allocation2 + $0x78] sm:$0xff] %v866_v36 }
 0x2b7   :  { %946 = vst [vmem:[#allocation2 + $0x68] sm:$0xff] %v858_v38 }
 0x2b9   :  { %v1218_v39 = vpop.f32.mrb[32].mxu0 }
 0x2ba   :  { %v879_v40 = vadd.f32 %v1218_v39, %v1541_v8  ;;  %v870_v41 = vpop.f32.mrb[33].mxu0 }
 0x2bb   :  { %v871_v42 = vadd.f32 %v1541_v8, %v870_v41  ;;  %v1219_v43 = vpop.f32.mrb[34].mxu0 }
 0x2bc   :  { %951 = vst [vmem:[#allocation2 + $0x90] sm:$0xff] %v879_v40  ;;  %v882_v44 = vadd.f32 %v1219_v43, %v1541_v8  ;;  %v873_v45 = vpop.f32.mrb[35].mxu0 }
 0x2bd   :  { %949 = vst [vmem:[#allocation2 + $0x80] sm:$0xff] %v871_v42  ;;  %v874_v46 = vadd.f32 %v1541_v8, %v873_v45 }
 0x2be   :  { %952 = vst [vmem:[#allocation2 + $0x98] sm:$0xff] %v882_v44 }
 0x2bf   :  { %950 = vst [vmem:[#allocation2 + $0x88] sm:$0xff] %v874_v46 }
 0x2c1   :  { %v1222_v47 = vpop.f32.mrb[36].mxu0 }
 0x2c2   :  { %v895_v48 = vadd.f32 %v1222_v47, %v1541_v8  ;;  %v886_v49 = vpop.f32.mrb[37].mxu0 }
 0x2c3   :  { %v887_v50 = vadd.f32 %v1541_v8, %v886_v49  ;;  %v1223_v51 = vpop.f32.mrb[38].mxu0 }
 0x2c4   :  { %955 = vst [vmem:[#allocation2 + $0xb0] sm:$0xff] %v895_v48  ;;  %v898_v52 = vadd.f32 %v1223_v51, %v1541_v8  ;;  %v889_v53 = vpop.f32.mrb[39].mxu0 }
 0x2c5   :  { %953 = vst [vmem:[#allocation2 + $0xa0] sm:$0xff] %v887_v50  ;;  %v890_v54 = vadd.f32 %v1541_v8, %v889_v53 }
 0x2c6   :  { %956 = vst [vmem:[#allocation2 + $0xb8] sm:$0xff] %v898_v52 }
 0x2c7   :  { %954 = vst [vmem:[#allocation2 + $0xa8] sm:$0xff] %v890_v54 }
 0x2c9   :  { %v1226_v55 = vpop.f32.mrb[40].mxu0 }
 0x2ca   :  { %v911_v56 = vadd.f32 %v1226_v55, %v1541_v8  ;;  %v902_v57 = vpop.f32.mrb[41].mxu0 }
 0x2cb   :  { %v903_v58 = vadd.f32 %v1541_v8, %v902_v57  ;;  %v1227_v59 = vpop.f32.mrb[42].mxu0 }
 0x2cc   :  { %959 = vst [vmem:[#allocation2 + $0xd0] sm:$0xff] %v911_v56  ;;  %v914_v60 = vadd.f32 %v1227_v59, %v1541_v8  ;;  %v905_v61 = vpop.f32.mrb[43].mxu0 }
 0x2cd   :  { %957 = vst [vmem:[#allocation2 + $0xc0] sm:$0xff] %v903_v58  ;;  %v906_v62 = vadd.f32 %v1541_v8, %v905_v61 }
 0x2ce   :  { %960 = vst [vmem:[#allocation2 + $0xd8] sm:$0xff] %v914_v60 }
 0x2cf   :  { %958 = vst [vmem:[#allocation2 + $0xc8] sm:$0xff] %v906_v62 }
 0x2d1   :  { %v1230_v63 = vpop.f32.mrb[44].mxu0 }
 0x2d2   :  { %v927_v1 = vadd.f32 %v1230_v63, %v1541_v8  ;;  %v918_v2 = vpop.f32.mrb[45].mxu0 }
 0x2d3   :  { %v919_v4 = vadd.f32 %v1541_v8, %v918_v2  ;;  %v1231_v5 = vpop.f32.mrb[46].mxu0 }
 0x2d4   :  { %963 = vst [vmem:[#allocation2 + $0xf0] sm:$0xff] %v927_v1  ;;  %v930_v6 = vadd.f32 %v1231_v5, %v1541_v8  ;;  %v921_v7 = vpop.f32.mrb[47].mxu0 }
 0x2d5   :  { %961 = vst [vmem:[#allocation2 + $0xe0] sm:$0xff] %v919_v4  ;;  %v922_v9 = vadd.f32 %v1541_v8, %v921_v7 }
 0x2d6   :  { %964 = vst [vmem:[#allocation2 + $0xf8] sm:$0xff] %v930_v6 }
 0x2d7   :  { %962 = vst [vmem:[#allocation2 + $0xe8] sm:$0xff] %v922_v9 }
 0x2d8   :  { %1284 = shalt.err (!%p1281_p4)
}
 0x2d9   :  { %s1285_s25 = scalar_lea.hbm %s1594_s7, 4096 }
 0x2da   :  { %p1286_p5 = scmp.ne.s32.totalorder %s1594_s7, %s1285_s25  ;;  %p1289_p6 = scmp.lt.u32.totalorder %s1285_s25, %s1594_s7 }
 0x2dc   :  { %p1291_p7 = pnand %p1289_p6, %p1286_p5 }
 0x2de   :  { %1294 = shalt.err (!%p1291_p7)
}
 0x2df   :  { %s1298_s29 = smov 128   ;;  %s1299_s30 = smov 8  }
 0x2e0   :  { %976 = dma.vmem_to_hbm [thread:$0]  %s971_s21, 4096, %s1594_s7, [#allocation3], %s1298_s29, %s1298_s29, %s1299_s30  }
 0x2e1   :  { %1295 = dma.done.wait [#allocation3], 4096  }
 0x2e2   :  { %1296 = vsyncadd [#allocation3], 4294963200 }
 0x2e3   :  { %980 = vsyncpa [#allocation3], 1 }

</bundles_post_ra>
